<compile_context>
chip_gen: v5e
topology: v5e:2x2
jax: 0.10.0
libtpu: 0.0.40
codegen_flags: <defaults>
</compile_context>

<pallas_src>
import jax
import jax.numpy as jnp
from jax import lax
from jax.experimental import pallas as pl
from jax.experimental.pallas import tpu as pltpu


def _landmark_head_kernel(x_ref, w_ref, b_ref, o_ref):
    # x_ref: (1, Cin, t)   channels-first pixel tile (one image, t pixels)
    # w_ref: (Cout, Cin)   VMEM-resident across the whole grid
    # b_ref: (Cout, 1)     f32
    # o_ref: (1, Cout, t)  lane-dense output tile (lane dim = pixels)
    acc = lax.dot_general(
        w_ref[...],
        x_ref[0],
        dimension_numbers=(((1,), (0,)), ((), ())),
        preferred_element_type=jnp.float32,
    )  # (Cout, t), f32 accumulate on the MXU
    o_ref[0] = (acc + b_ref[...]).astype(o_ref.dtype)


def _pick_pixel_tile(HW, N, Cin, Cout, itemsize, vmem_budget_bytes,
                     max_pixels_per_tile):
    """Choose the pixel-tile size t and the number of HW tiles."""
    cout_pad = -(-Cout // 8) * 8                       # sublane padding of out tile
    bytes_per_px = 2 * (Cin + cout_pad) * itemsize     # double-buffered in + out
    t_cap = max(128, (vmem_budget_bytes // bytes_per_px) // 128 * 128)
    if max_pixels_per_tile is not None:
        t_cap = max(128, min(t_cap, (max_pixels_per_tile // 128) * 128))
    if HW <= t_cap:
        t = HW            # full-extent block: any size is legal
    else:
        t = t_cap         # multiple of 128; cdiv grid handles the ragged tail
    n_tiles = pl.cdiv(HW, t)
    # v7x megacore: guarantee >=2 parallel grid points when it is cheap to do so.
    if N * n_tiles < 2 and HW > 128:
        half = (HW + 1) // 2
        t = -(-half // 128) * 128                      # multiple of 128, >= HW/2
        n_tiles = pl.cdiv(HW, t)
    return t, n_tiles


def landmark_head_forward(x_nchw, weight, bias, *, num_anchors=2,
                          vmem_budget_bytes=20 * 1024 * 1024,
                          max_pixels_per_tile=None):
    """1x1-conv LandmarkHead forward.

    x_nchw : (N, Cin, H, W) NCHW activations (f32 or bf16)
    weight : (Cout, Cin) or (Cout, Cin, 1, 1) 1x1 conv weight
    bias   : (Cout,)
    returns: (N, H*W*num_anchors, 10)
    """
    N, Cin, H, W = x_nchw.shape
    if weight.ndim == 4:                                # PyTorch (Cout, Cin, 1, 1)
        weight = weight.reshape(weight.shape[0], weight.shape[1])
    Cout = weight.shape[0]
    assert Cout == num_anchors * 10
    HW = H * W

    # NCHW -> (N, Cin, H*W) is a free, contiguous view; no activation transpose.
    x3 = x_nchw.reshape(N, Cin, HW)
    w = weight.astype(x_nchw.dtype)                     # (Cout, Cin)
    b2 = bias.astype(jnp.float32).reshape(Cout, 1)

    t, n_tiles = _pick_pixel_tile(HW, N, Cin, Cout, x_nchw.dtype.itemsize,
                                  vmem_budget_bytes, max_pixels_per_tile)
    grid = (N, n_tiles)

    y = pl.pallas_call(
        _landmark_head_kernel,
        out_shape=jax.ShapeDtypeStruct((N, Cout, HW), x_nchw.dtype),
        grid_spec=pltpu.PrefetchScalarGridSpec(
            num_scalar_prefetch=0,
            grid=grid,
            in_specs=[
                pl.BlockSpec((1, Cin, t), lambda n, i: (n, 0, i)),
                pl.BlockSpec((Cout, Cin), lambda n, i: (0, 0)),
                pl.BlockSpec((Cout, 1), lambda n, i: (0, 0)),
            ],
            out_specs=pl.BlockSpec((1, Cout, t), lambda n, i: (n, 0, i)),
        ),
        compiler_params=pltpu.CompilerParams(
            dimension_semantics=("parallel", "parallel"),
            vmem_limit_bytes=32 * 1024 * 1024,
        ),
    )(x3, w, b2)

    # Single XLA transpose of the (smaller) output tensor -> NHWC; the final
    # row-major view (N, HW, Cout) == (N, HW*num_anchors, 10) is free.
    return jnp.transpose(y, (0, 2, 1)).reshape(N, HW * num_anchors, 10)


def _reference(x_nchw, weight, bias, num_anchors=2):
    # Pure-JAX reference of the PyTorch forward.
    y = jnp.einsum("nchw,oc->nohw", x_nchw, weight) + bias[None, :, None, None]
    y = jnp.transpose(y, (0, 2, 3, 1))
    N = x_nchw.shape[0]
    return y.reshape(N, -1, 10)


if __name__ == "__main__":
    key = jax.random.PRNGKey(0)
    k_x, k_w, k_b = jax.random.split(key, 3)

    # Small shapes consistent with the module: inchannels=32, num_anchors=2.
    N, Cin, H, W = 2, 32, 16, 16
    num_anchors = 2
    Cout = num_anchors * 10

    x = jax.random.normal(k_x, (N, Cin, H, W), dtype=jnp.float32)
    weight = jax.random.normal(k_w, (Cout, Cin), dtype=jnp.float32) * 0.05
    bias = jax.random.normal(k_b, (Cout,), dtype=jnp.float32) * 0.05

    out = landmark_head_forward(x, weight, bias, num_anchors=num_anchors)
    out = jax.block_until_ready(out)
    ref = _reference(x, weight, bias, num_anchors=num_anchors)
    assert out.shape == (N, H * W * num_anchors, 10), out.shape
    assert jnp.allclose(out, ref, atol=1e-4, rtol=1e-4)

    # Ragged / multi-tile path: H*W = 400 with a 128-pixel tile -> 4 blocks,
    # last one partial.  Exercises the cdiv grid / masked lane writeback with
    # the new lane-dense (Cout, t) output layout.
    H2 = W2 = 20
    x2 = jax.random.normal(k_x, (N, Cin, H2, W2), dtype=jnp.float32)
    out2 = landmark_head_forward(x2, weight, bias, num_anchors=num_anchors,
                                 max_pixels_per_tile=128)
    out2 = jax.block_until_ready(out2)
    ref2 = _reference(x2, weight, bias, num_anchors=num_anchors)
    assert out2.shape == (N, H2 * W2 * num_anchors, 10), out2.shape
    assert jnp.allclose(out2, ref2, atol=1e-4, rtol=1e-4)

    # Single-image path: checks the >=2-grid-point split (v7x megacore) and the
    # resulting ragged second tile (HW=576 -> two 384-pixel blocks).
    x3s = jax.random.normal(k_x, (1, Cin, 24, 24), dtype=jnp.float32)
    out3 = landmark_head_forward(x3s, weight, bias, num_anchors=num_anchors)
    out3 = jax.block_until_ready(out3)
    ref3 = _reference(x3s, weight, bias, num_anchors=num_anchors)
    assert out3.shape == (1, 24 * 24 * num_anchors, 10), out3.shape
    assert jnp.allclose(out3, ref3, atol=1e-4, rtol=1e-4)

    print("KERNEL_OK")
</pallas_src>

<mosaic_0001>
module attributes {stable_mosaic.version = 11 : i64} {
  func.func @_landmark_head_kernel(%arg0: i32, %arg1: i32, %arg2: memref<1x32x256xf32, #tpu.memory_space<vmem>>, %arg3: memref<20x32xf32, #tpu.memory_space<vmem>>, %arg4: memref<20x1xf32, #tpu.memory_space<vmem>>, %arg5: memref<1x20x256xf32, #tpu.memory_space<vmem>>) attributes {dimension_semantics = [#tpu.dimension_semantics<parallel>, #tpu.dimension_semantics<parallel>], iteration_bounds = array<i64: 2, 1>, scalar_prefetch = 0 : i64, scratch_operands = 0 : i64, tpu.core_type = #tpu.core_type<tc>, window_params = [{transform_indices = @transform_0, window_bounds = array<i64: 1, 32, 256>}, {pipeline_mode = #tpu.pipeline_mode<synchronous>, transform_indices = @transform_1, window_bounds = array<i64: 20, 32>}, {pipeline_mode = #tpu.pipeline_mode<synchronous>, transform_indices = @transform_2, window_bounds = array<i64: 20, 1>}, {transform_indices = @transform_3, window_bounds = array<i64: 1, 20, 256>}]} {
    %c0 = arith.constant 0 : index
    %c0_0 = arith.constant 0 : index
    %0 = vector.load %arg3[%c0, %c0_0] : memref<20x32xf32, #tpu.memory_space<vmem>>, vector<20x32xf32>
    %c0_1 = arith.constant 0 : index
    %c0_2 = arith.constant 0 : index
    %c0_3 = arith.constant 0 : index
    %1 = vector.load %arg2[%c0_1, %c0_2, %c0_3] : memref<1x32x256xf32, #tpu.memory_space<vmem>>, vector<1x32x256xf32>
    %2 = vector.shape_cast %1 : vector<1x32x256xf32> to vector<32x256xf32>
    %cst = arith.constant dense<0.000000e+00> : vector<20x256xf32>
    %3 = tpu.matmul %0, %2, %cst {dimension_numbers = #tpu.dot_dimension_numbers<[1], [0], [0], [1], [0, 0, 1, 1], [], []>} : vector<20x32xf32>, vector<32x256xf32>, vector<20x256xf32> -> vector<20x256xf32>
    %c0_4 = arith.constant 0 : index
    %c0_5 = arith.constant 0 : index
    %4 = vector.load %arg4[%c0_4, %c0_5] : memref<20x1xf32, #tpu.memory_space<vmem>>, vector<20x1xf32>
    %5 = vector.broadcast %4 : vector<20x1xf32> to vector<20x256xf32>
    %6 = arith.addf %3, %5 : vector<20x256xf32>
    %c0_6 = arith.constant 0 : index
    %c0_7 = arith.constant 0 : index
    %c0_8 = arith.constant 0 : index
    %7 = vector.load %arg5[%c0_6, %c0_7, %c0_8] : memref<1x20x256xf32, #tpu.memory_space<vmem>>, vector<1x20x256xf32>
    %8 = vector.shape_cast %7 : vector<1x20x256xf32> to vector<20x256xf32>
    %9 = vector.shape_cast %6 : vector<20x256xf32> to vector<1x20x256xf32>
    tpu.vector_store %arg5[%c0_6, %c0_7, %c0_8], %9 {strides = array<i32>} : memref<1x20x256xf32, #tpu.memory_space<vmem>>, vector<1x20x256xf32>,
    return
  }
  func.func @transform_0(%arg0: i32, %arg1: i32) -> (i32, i32, i32) {
    %c0_i32 = arith.constant 0 : i32
    %c0_i32_0 = arith.constant 0 : i32
    return %arg0, %c0_i32, %arg1 : i32, i32, i32
  }
  func.func @transform_1(%arg0: i32, %arg1: i32) -> (i32, i32) {
    %c0_i32 = arith.constant 0 : i32
    %c0_i32_0 = arith.constant 0 : i32
    %c0_i32_1 = arith.constant 0 : i32
    return %c0_i32, %c0_i32_0 : i32, i32
  }
  func.func @transform_2(%arg0: i32, %arg1: i32) -> (i32, i32) {
    %c0_i32 = arith.constant 0 : i32
    %c0_i32_0 = arith.constant 0 : i32
    %c0_i32_1 = arith.constant 0 : i32
    return %c0_i32, %c0_i32_0 : i32, i32
  }
  func.func @transform_3(%arg0: i32, %arg1: i32) -> (i32, i32, i32) {
    %c0_i32 = arith.constant 0 : i32
    %c0_i32_0 = arith.constant 0 : i32
    return %arg0, %c0_i32, %arg1 : i32, i32, i32
  }
}

</mosaic_0001>

<bundles_post_ra>
// kernel: tpu_custom_call.1
= control target key start
LH: loop header
LB: loop body
LE: loop exit
PB: predicated region body
PF: predicated region fallthrough
CT: control target
= control target key end

     0   :  { %8 = vsyncpa [#allocation3], 0  ;;  %s718_s0 = inlined_call_operand.hbm [shape: f32[2,32,256], index: 0, kind: input, shape index: {}]   ;;  %s719_s1 = inlined_call_operand.vmem [shape: f32[20,32], index: 1, kind: input, shape index: {}]   ;;  %s720_s2 = inlined_call_operand.vmem [shape: f32[20,1], index: 2, kind: input, shape index: {}]   ;;  %s721_s3 = inlined_call_operand.vmem [shape: f32[2,20,256], index: 3, kind: output, shape index: {}]  }
   0x1   :  { %10 = vsyncpa [#allocation3 + $0x1], 0  ;;  %s606_s12 = smov 0   ;;  %s608_s13 = smov 0  }
   0x2   :  { %s610_s14 = smov 0   ;;  %s612_s15 = smov 0  }
   0x3   :  { %s614_s16 = smov 0   ;;  %s616_s17 = smov 0  }
   0x4 LB: > { %s413_s18 = sadd.s32 4294967295, %s581_s17   ;;  %s28_s19 = sadd.s32 1, %s577_s16  ;;  %s581_s17 = sphi %s616_s17, %s16_s17   ;;  %s577_s16 = sphi %s614_s16, %s728_s16   ;;  %s573_s15 = sphi %s612_s15, %s727_s15   ;;  %s569_s14 = sphi %s610_s14, %s726_s14   ;;  %s565_s13 = sphi %s608_s13, %s725_s13   ;;  %s561_s12 = sphi %s606_s12, %s724_s12  }
   0x5   : > { %p30_p0 = scmp.ge.s32.totalorder %s28_s19, 2  ;;  %s37_s20 = sadd.s32 1, %s569_s14 }
   0x6   : > { %p44_p1 = scmp.ne.s32.totalorder %s569_s14, %s565_s13  ;;  %p45_p2 = scmp.eq.s32.totalorder %s581_s17, 0 }
   0x7   : > { %s730_s19 = smov (%p30_p0, %s28_s19), 0  ;;  %p50_p4 = scmp.ne.s32.totalorder %s565_s13, %s561_s12 }
   0x8   : > { %p642_p3 = por %p45_p2, %p44_p1  ;;  %s32_s22 = ssub.s32 %s577_s16, %s730_s19 }
   0x9   : > { %p51_p5 = scmp.eq.s32.totalorder %s413_s18, 0  ;;  %p35_p6 = scmp.eq.s32.totalorder %s32_s22, 0 }
   0xa   : > { %p447_p8 = scmp.lt.s32.totalorder %s581_s17, 2  ;;  %s150_s25 = sand.u32 1, %s569_s14  }
   0xb   : > { %p649_p7 = por %p51_p5, %p50_p4  ;;  %s431_s26 = sshll.u32 %s577_s16, 6 }
   0xc   : > { %s655_s24 = scalar_select %p35_p6, %s569_s14, %s37_s20  }
   0xd   : > { %s417_s27 = sshll.u32 %s150_s25, 6  ;;  %s161_s30 = scalar_lea.hbm %s718_s0, %s431_s26 }
   0xe   : > { %s162_s4 = sshll.u32 %s161_s30, 4  ;;  %s154_s5 = scalar_lea.vmem [#allocation2], %s417_s27  ;;  %s163_s4 = int_to_ptr.hbm [resolvable:$true] %s162_s4 }
   0xf   : > { %s164_s6 = sshll.u32 %s154_s5, 4  ;;  %p444_p9 = pnand %p447_p8, %p642_p3  ;;  %s165_s6 = int_to_ptr.vmem [resolvable:$true] %s164_s6 }
  0x10   : > { %p420_p10 = scmp.ge.s32.totalorder %s581_s17, 1  ;;  %p172_p11 = scmp.lt.s32.totalorder %s581_s17, 3 }
  0x11   : > { %s151_s7 = scalar_lea.sflag [#allocation3], %s150_s25  ;;  %s583_s8 = smov 256  }
  0x12   : > { %s584_s9 = smov 16   ;;  %p173_p12 = pnand %p420_p10, %p172_p11 }
  0x13   : > { %446 = dma.hbm_to_vmem [thread:$0]  (!%p444_p9), %s163_s4, 1024, %s165_s6, %s151_s7, %s583_s8, %s583_s8, %s584_s9  }
  0x14   : > { %176 = sbr.rel (%p173_p12) target bundleno = 179 (0xb3), region = 32  ;;  %s178_s10 = sand.u32 (!%p173_p12), 1, %s565_s13  }
  0x15   : > { %s421_s11 = sshll.u32 (!%p173_p12), %s178_s10, 6  ;;  %s179_s12 = scalar_lea.sflag (!%p173_p12), [#allocation3], %s178_s10 }
  0x16   : > { %s182_s18 = scalar_lea.vmem (!%p173_p12), [#allocation2], %s421_s11 }
  0x19   : > { %556 = dma.done.wait (%p649_p7), %s179_s12, 1024  }
  0x1a   : > { %558 = vsyncadd (%p649_p7), %s179_s12, 4294966272  ;;  %v585_v0 = vmov 0   ;;  %v230_v1 = vld [vmem:[%s182_s18 + $0x30] sm:$0xff]  ;;  %v231_v2 = vld [vmem:[%s182_s18 + $0x38] sm:$0xff]  ;;  %vm250_vm0 = vcmask 261120   ;;  %p212_p13 = scmp.lt.s32.totalorder %s573_s15, 1 }
  0x1b   : > { %499 = vset.pattern.permute.xlu0 %v585_v0  ;;  %500 = vset.pattern.permute.xlu1 %v585_v0  ;;  %v228_v3 = vld [vmem:[%s182_s18 + $0x20] sm:$0xff]  ;;  %v229_v4 = vld [vmem:[%s182_s18 + $0x28] sm:$0xff]  ;;  %v226_v5 = vld [vmem:[%s182_s18 + $0x10] sm:$0xff] }
  0x1c   : > { %432 = vmatpush.msra.mxu2 %v230_v1  ;;  %436 = vmatpush.msra.mxu3 %v231_v2  ;;  %v227_v6 = vld [vmem:[%s182_s18 + $0x18] sm:$0xff]  ;;  %v224_v7 = vld [vmem:[%s182_s18] sm:$0xff]  ;;  %v225_v8 = vld [vmem:[%s182_s18 + $0x8] sm:$0xff]  ;;  %s732_s15 = smov (!%p212_p13, %s573_s15), 1 }
  0x1d   : > { %272 = vmatpush.msra.mxu0 %v230_v1  ;;  %298 = vmatpush.msra.mxu1 %v231_v2  ;;  %v222_v9 = vld [vmem:[%s719_s1 + $0x8] sm:$0xff]  ;;  %v221_v10 = vld [vmem:[%s719_s1] sm:$0xff]  ;;  %v234_v12 = vld [vmem:[%s720_s2 + $0x10] sm:$0xf]  ;;  %s440_s6 = smul.u32 48, %s732_s15 }
  0x1e   : > { %433 = vmatpush.msra.mxu2 %v228_v3  ;;  %437 = vmatpush.msra.mxu3 %v229_v4  ;;  %v232_v11 = vld [vmem:[%s720_s2] sm:$0xff]  ;;  %v223_v13 = vld [vmem:[%s719_s1 + $0x10] sm:$0xf]  ;;  %v233_v14 = vld [vmem:[%s720_s2 + $0x8] sm:$0xff] }
  0x1f   : > { %273 = vmatpush.msra.mxu0 %v228_v3  ;;  %299 = vmatpush.msra.mxu1 %v229_v4  ;;  %s219_s9 = scalar_lea.vmem %s721_s3, %s440_s6 }
  0x20   : > { %434 = vmatpush.msra.mxu2 %v226_v5  ;;  %438 = vmatpush.msra.mxu3 %v227_v6 }
  0x21   : > { %274 = vmatpush.msra.mxu0 %v226_v5  ;;  %300 = vmatpush.msra.mxu1 %v227_v6 }
  0x22   : > { %435 = vmatpush.msra.mxu2 %v224_v7  ;;  %439 = vmatpush.msra.mxu3 %v225_v8 }
  0x23   : > { %424 = vmatmul.msk.f32.vlgmr.msra.gmra.mxu2 %vm250_vm0, %v222_v9  ;;  %427 = vmatmul.msk.f32.vlgmr.msra.gmra.mxu3 %vm250_vm0, %v222_v9 }
  0x24   : > { %275 = vmatpush.msra.mxu0 %v224_v7  ;;  %301 = vmatpush.msra.mxu1 %v225_v8 }
  0x25   : > { %423 = vmatmul.msk.f32.vlgmr.msra.gmra.mxu0 %vm250_vm0, %v221_v10  ;;  %426 = vmatmul.msk.f32.vlgmr.msra.gmra.mxu1 %vm250_vm0, %v221_v10 }
  0x26   : > { %237 = vperm.xlu0 %499, %v232_v11   ;;  %247 = vperm.xlu1 %500, %v234_v12  }
  0x2b   : > { %425 = vmatmul.msk.f32.gmra.mxu2 %vm250_vm0, %v223_v13  ;;  %428 = vmatmul.msk.f32.gmra.mxu3 %vm250_vm0, %v223_v13 }
  0x2e   : > { %242 = vperm.xlu0 %499, %v233_v14  }
  0x98   : > { %v238_v15 = vpop.permute.xlu0 %237  ;;  %v248_v25 = vpop.permute.xlu1 %247 }
  0xa0   : > { %v243_v20 = vpop.permute.xlu0 %242 }
  0xa2   : > { %v277_v16 = vpop.f32.mrf.mxu0  ;;  %v303_v17 = vpop.f32.mrf.mxu1 }
  0xa3   : > { %v278_v18 = vadd.f32 %v277_v16, %v238_v15  ;;  %v304_v19 = vadd.f32 %v303_v17, %v238_v15 }
  0xa5   : > { %312 = vst [vmem:[%s219_s9] sm:$0xff] %v278_v18 }
  0xa6   : > { %v280_v21 = vpop.f32.mrf.mxu2  ;;  %313 = vst [vmem:[%s219_s9 + $0x8] sm:$0xff] %v304_v19  ;;  %v306_v22 = vpop.f32.mrf.mxu3 }
  0xa7   : > { %v281_v23 = vadd.f32 %v280_v21, %v243_v20  ;;  %v307_v24 = vadd.f32 %v306_v22, %v243_v20 }
  0xa9   : > { %314 = vst [vmem:[%s219_s9 + $0x10] sm:$0xff] %v281_v23 }
  0xaa   : > { %315 = vst [vmem:[%s219_s9 + $0x18] sm:$0xff] %v307_v24 }
  0xae   : > { %v283_v26 = vpop.f32.mrf.mxu2  ;;  %v309_v27 = vpop.f32.mrf.mxu3 }
  0xaf   : > { %v284_v28 = vadd.f32 %v283_v26, %v248_v25  ;;  %v310_v29 = vadd.f32 %v309_v27, %v248_v25 }
  0xb1   : > { %316 = vst [vmem:[%s219_s9 + $0x20] sm:$0xf] %v284_v28 }
  0xb2   : > { %317 = vst [vmem:[%s219_s9 + $0x28] sm:$0xf] %v310_v29 }
  0xb3 PF: > { %s16_s17 = sadd.s32 1, %s581_s17   ;;  %s724_s12 = smov %s565_s13 }
  0xb4   : > { %p13_p0 = scmp.ge.s32.totalorder %s16_s17, 4   ;;  %s725_s13 = smov %s569_s14 }
  0xb5   : > { %s726_s14 = smov %s655_s24  ;;  %s727_s15 = smov %s577_s16 }
  0xb6   : > { %s728_s16 = smov %s730_s19  ;;  %15 = sbr.rel (!%p13_p0) target bundleno = 4 (0x4), region = 72 }
  0xbb   :  { %348 = vsyncpa [#allocation3], 1 }
  0xbc   :  { %350 = vsyncpa [#allocation3 + $0x1], 1 }

</bundles_post_ra>
